<compile_context>
chip_gen: v6e
topology: v6e:2x2x1
jax: 0.10.0
libtpu: 0.0.40
codegen_flags: <defaults>
</compile_context>

<pallas_src>
import jax
import jax.numpy as jnp
from jax.experimental import pallas as pl
from jax.experimental.pallas import tpu as pltpu

_LANE = 128
_SUBLANE = 8
_HP = 128            # hidden dim 40 zero-padded to one lane group
_MIN_TILE_B = 1024
_MAX_TILE_B = 8192


def _round_up(x, m):
    return (x + m - 1) // m * m


def _vmem_budget_bytes():
    """Per-chip VMEM budget for kernel buffers (~half of physical VMEM)."""
    try:
        info = pltpu.get_tpu_info()
        cap = int(getattr(info, "vmem_capacity_bytes", 0) or 0)
        if cap > 0:
            return max(16 << 20, min(cap // 2, 64 << 20))
    except Exception:
        pass
    return 32 << 20  # safe default on v5e / v6e / v7x


def _pick_tile_b(batch, d, vmem_budget):
    """Largest batch tile that fits the VMEM budget, clamped to [1024, 8192]."""
    d_pad = _round_up(max(d, 1), _LANE)              # lane footprint of one x row
    # x double buffer + h intermediate + fc2 staging, bytes per batch row.
    per_row = 4 * (2 * d_pad + 4 * _HP) + 64
    fit = int(vmem_budget * 0.75) // per_row
    tile_b = max(_MIN_TILE_B, min(_MAX_TILE_B, fit))
    tile_b = max(_LANE, (tile_b // _LANE) * _LANE)   # lane multiple -> dense output
    b_cap = _round_up(batch, _SUBLANE)
    return min(tile_b, b_cap)


def _critic_kernel(x_ref, w1_ref, b1_ref, w2_ref, b2_ref, o_ref):
    # x:  (TILE_B, D)     w1: (D, HP)     b1: (1, HP)
    # w2: (8, HP)  (row 0 = real fc2 weights, rows 1..7 zero)
    # b2: (1, 1)          o:  (1, TILE_B)  (lane-dense output row)

    # fc1 on the MXU (f32 accumulation); bias + ReLU on the VPU.
    h = jnp.dot(x_ref[...], w1_ref[...], preferred_element_type=jnp.float32)
    h = jnp.maximum(h + b1_ref[...], 0.0)                     # (TILE_B, HP)

    # fc2 as w2 @ h^T: contraction over the hidden dim of both operands (the
    # native q@k^T MXU pattern), so the result is already lane-dense — one
    # batch row per output lane, no masked width-1 stores.
    y = jax.lax.dot_general(
        w2_ref[...], h,
        dimension_numbers=(((1,), (1,)), ((), ())),
        preferred_element_type=jnp.float32)                   # (8, TILE_B)
    o_ref[...] = (y[0:1, :] + b2_ref[...]).astype(o_ref.dtype)


def critic_forward(x, w1, b1, w2, b2, *, tile_b=None):
    """Fused Critic forward pass as a single pipelined Pallas TPU kernel.

    Args:
      x:  (B, D) float32 (or bfloat16 for the reduced-bandwidth path)
      w1: (D, 40) float32, b1: (40,) float32
      w2: (40, 1) float32, b2: (1,) float32
    Returns:
      (B, 1) float32
    """
    B, D = x.shape
    H = w1.shape[1]
    HP = _HP
    assert H <= HP, "hidden dim must be <= 128"

    # Keep x in f32/bf16 without copying; anything else is cast to f32.
    if x.dtype not in (jnp.dtype(jnp.float32), jnp.dtype(jnp.bfloat16)):
        x = x.astype(jnp.float32)
    in_dtype = x.dtype

    # One-time (tiny) weight preprocessing outside the kernel.
    w1p = jnp.pad(w1.astype(in_dtype), ((0, 0), (0, HP - H)))           # (D, HP)
    b1p = jnp.pad(b1.astype(jnp.float32), (0, HP - H)).reshape(1, HP)   # (1, HP)
    w2p = jnp.pad(w2.astype(jnp.float32).reshape(1, H),
                  ((0, 7), (0, HP - H)))                                # (8, HP)
    b2p = b2.astype(jnp.float32).reshape(1, 1)                          # (1, 1)

    vmem_budget = _vmem_budget_bytes()
    if tile_b is None:
        tile_b = _pick_tile_b(B, D, vmem_budget)
    else:
        tile_b = min(max(_SUBLANE, _round_up(int(tile_b), _SUBLANE)),
                     _round_up(B, _SUBLANE))

    num_tiles = pl.cdiv(B, tile_b)
    b_pad = num_tiles * tile_b   # only the (tiny) output is padded; x is NOT copied

    cost = pl.CostEstimate(
        flops=2 * B * D * HP + 2 * B * HP,
        transcendentals=0,
        bytes_accessed=(B * D + B + D * HP + 9 * HP + 1) * 4,
    )

    out = pl.pallas_call(
        _critic_kernel,
        out_shape=jax.ShapeDtypeStruct((1, b_pad), jnp.float32),
        grid=(num_tiles,),
        in_specs=[
            # x: tiled over the batch, software-pipelined (double-buffered).
            # The last block may be a partial boundary block; its stale rows
            # only reach the padded output tail, which is sliced off below.
            pl.BlockSpec((tile_b, D), lambda i: (i, 0)),
            # Weights / biases: constant index_map -> DMA'd once, VMEM-resident.
            pl.BlockSpec((D, HP), lambda i: (0, 0)),
            pl.BlockSpec((1, HP), lambda i: (0, 0)),
            pl.BlockSpec((8, HP), lambda i: (0, 0)),
            pl.BlockSpec((1, 1), lambda i: (0, 0)),
        ],
        # Lane-dense output: one batch row per lane, contiguous HBM writeback.
        out_specs=pl.BlockSpec((1, tile_b), lambda i: (0, i)),
        compiler_params=pltpu.CompilerParams(
            # NOTE: on v7x, pltpu.CORE_PARALLEL on this axis would shard the
            # batch over both TensorCores; "parallel" kept for v5e/v6e safety.
            dimension_semantics=("parallel",),
            vmem_limit_bytes=int(vmem_budget),
        ),
        cost_estimate=cost,
    )(x, w1p, b1p, w2p, b2p)

    return out.reshape(-1)[:B].reshape(B, 1)


def init_critic_params(states_dim, key):
    """Deterministic init mimicking PyTorch nn.Linear default
    (uniform in [-1/sqrt(fan_in), 1/sqrt(fan_in)])."""
    k1, k2, k3, k4 = jax.random.split(key, 4)
    bound1 = 1.0 / jnp.sqrt(jnp.float32(states_dim))
    w1 = jax.random.uniform(k1, (states_dim, 40), jnp.float32, -bound1, bound1)
    b1 = jax.random.uniform(k2, (40,), jnp.float32, -bound1, bound1)
    bound2 = 1.0 / jnp.sqrt(jnp.float32(40))
    w2 = jax.random.uniform(k3, (40, 1), jnp.float32, -bound2, bound2)
    b2 = jax.random.uniform(k4, (1,), jnp.float32, -bound2, bound2)
    return w1, b1, w2, b2


def critic_reference(x, w1, b1, w2, b2):
    h = jnp.maximum(x @ w1 + b1, 0.0)
    return h @ w2 + b2


if __name__ == "__main__":
    key = jax.random.PRNGKey(0)
    k_params, k_x1, k_x2 = jax.random.split(key, 3)

    states_dim = 32
    w1, b1, w2, b2 = init_critic_params(states_dim, k_params)

    # Small batch: single tile, full blocks.
    x_small = jax.random.normal(k_x1, (8, states_dim), jnp.float32)
    out_small = jax.block_until_ready(critic_forward(x_small, w1, b1, w2, b2))
    ref_small = critic_reference(x_small, w1, b1, w2, b2)
    assert out_small.shape == (8, 1)
    assert jnp.allclose(out_small, ref_small, atol=1e-5, rtol=1e-5)

    # Ragged batch, default tiling: single tile with a partial boundary block.
    x_big = jax.random.normal(k_x2, (300, states_dim), jnp.float32)
    out_def = jax.block_until_ready(critic_forward(x_big, w1, b1, w2, b2))
    ref_big = critic_reference(x_big, w1, b1, w2, b2)
    assert out_def.shape == (300, 1)
    assert jnp.allclose(out_def, ref_big, atol=1e-5, rtol=1e-5)

    # Ragged batch, forced multi-tile path: exercises the pipelined grid and
    # the partial last x block + padded output tail.
    out_multi = jax.block_until_ready(
        critic_forward(x_big, w1, b1, w2, b2, tile_b=128))
    assert out_multi.shape == (300, 1)
    assert jnp.allclose(out_multi, ref_big, atol=1e-5, rtol=1e-5)

    print("KERNEL_OK")
</pallas_src>

<mosaic_0001>
module attributes {stable_mosaic.version = 11 : i64} {
  func.func @_critic_kernel(%arg0: i32, %arg1: memref<8x32xf32, #tpu.memory_space<vmem>>, %arg2: memref<32x128xf32, #tpu.memory_space<vmem>>, %arg3: memref<1x128xf32, #tpu.memory_space<vmem>>, %arg4: memref<8x128xf32, #tpu.memory_space<vmem>>, %arg5: memref<1x1xf32, #tpu.memory_space<vmem>>, %arg6: memref<1x8xf32, #tpu.memory_space<vmem>>) attributes {dimension_semantics = [#tpu.dimension_semantics<parallel>], iteration_bounds = array<i64: 1>, scalar_prefetch = 0 : i64, scratch_operands = 0 : i64, tpu.core_type = #tpu.core_type<tc>, window_params = [{transform_indices = @transform_0, window_bounds = array<i64: 8, 32>}, {pipeline_mode = #tpu.pipeline_mode<synchronous>, transform_indices = @transform_1, window_bounds = array<i64: 32, 128>}, {pipeline_mode = #tpu.pipeline_mode<synchronous>, transform_indices = @transform_2, window_bounds = array<i64: 1, 128>}, {pipeline_mode = #tpu.pipeline_mode<synchronous>, transform_indices = @transform_3, window_bounds = array<i64: 8, 128>}, {pipeline_mode = #tpu.pipeline_mode<synchronous>, transform_indices = @transform_4, window_bounds = array<i64: 1, 1>}, {transform_indices = @transform_5, window_bounds = array<i64: 1, 8>}]} {
    %c0 = arith.constant 0 : index
    %c0_0 = arith.constant 0 : index
    %0 = vector.load %arg1[%c0, %c0_0] : memref<8x32xf32, #tpu.memory_space<vmem>>, vector<8x32xf32>
    %c0_1 = arith.constant 0 : index
    %c0_2 = arith.constant 0 : index
    %1 = vector.load %arg2[%c0_1, %c0_2] : memref<32x128xf32, #tpu.memory_space<vmem>>, vector<32x128xf32>
    %cst = arith.constant dense<0.000000e+00> : vector<8x128xf32>
    %2 = tpu.matmul %0, %1, %cst {dimension_numbers = #tpu.dot_dimension_numbers<[1], [0], [0], [1], [0, 0, 1, 1], [], []>} : vector<8x32xf32>, vector<32x128xf32>, vector<8x128xf32> -> vector<8x128xf32>
    %c0_3 = arith.constant 0 : index
    %c0_4 = arith.constant 0 : index
    %3 = vector.load %arg3[%c0_3, %c0_4] : memref<1x128xf32, #tpu.memory_space<vmem>>, vector<1x128xf32>
    %4 = vector.broadcast %3 : vector<1x128xf32> to vector<8x128xf32>
    %5 = arith.addf %2, %4 : vector<8x128xf32>
    %cst_5 = arith.constant 0.000000e+00 : f32
    %6 = vector.broadcast %cst_5 : f32 to vector<8x128xf32>
    %7 = arith.maximumf %5, %6 : vector<8x128xf32>
    %c0_6 = arith.constant 0 : index
    %c0_7 = arith.constant 0 : index
    %8 = vector.load %arg4[%c0_6, %c0_7] : memref<8x128xf32, #tpu.memory_space<vmem>>, vector<8x128xf32>
    %cst_8 = arith.constant dense<0.000000e+00> : vector<8x8xf32>
    %9 = tpu.matmul %8, %7, %cst_8 {dimension_numbers = #tpu.dot_dimension_numbers<[1], [1], [0], [0], [0, 0, 1, 0], [], []>} : vector<8x128xf32>, vector<8x128xf32>, vector<8x8xf32> -> vector<8x8xf32>
    %10 = vector.extract_strided_slice %9 {offsets = [0, 0], sizes = [1, 8], strides = [1, 1]} : vector<8x8xf32> to vector<1x8xf32>
    %c0_9 = arith.constant 0 : index
    %c0_10 = arith.constant 0 : index
    %11 = vector.load %arg5[%c0_9, %c0_10] : memref<1x1xf32, #tpu.memory_space<vmem>>, vector<1x1xf32>
    %12 = vector.broadcast %11 : vector<1x1xf32> to vector<1x8xf32>
    %13 = arith.addf %10, %12 : vector<1x8xf32>
    %c0_11 = arith.constant 0 : index
    %c0_12 = arith.constant 0 : index
    %14 = vector.load %arg6[%c0_11, %c0_12] : memref<1x8xf32, #tpu.memory_space<vmem>>, vector<1x8xf32>
    tpu.vector_store %arg6[%c0_11, %c0_12], %13 {strides = array<i32>} : memref<1x8xf32, #tpu.memory_space<vmem>>, vector<1x8xf32>,
    return
  }
  func.func @transform_0(%arg0: i32) -> (i32, i32) {
    %c0_i32 = arith.constant 0 : i32
    %c0_i32_0 = arith.constant 0 : i32
    return %arg0, %c0_i32 : i32, i32
  }
  func.func @transform_1(%arg0: i32) -> (i32, i32) {
    %c0_i32 = arith.constant 0 : i32
    %c0_i32_0 = arith.constant 0 : i32
    %c0_i32_1 = arith.constant 0 : i32
    return %c0_i32, %c0_i32_0 : i32, i32
  }
  func.func @transform_2(%arg0: i32) -> (i32, i32) {
    %c0_i32 = arith.constant 0 : i32
    %c0_i32_0 = arith.constant 0 : i32
    %c0_i32_1 = arith.constant 0 : i32
    return %c0_i32, %c0_i32_0 : i32, i32
  }
  func.func @transform_3(%arg0: i32) -> (i32, i32) {
    %c0_i32 = arith.constant 0 : i32
    %c0_i32_0 = arith.constant 0 : i32
    %c0_i32_1 = arith.constant 0 : i32
    return %c0_i32, %c0_i32_0 : i32, i32
  }
  func.func @transform_4(%arg0: i32) -> (i32, i32) {
    %c0_i32 = arith.constant 0 : i32
    %c0_i32_0 = arith.constant 0 : i32
    %c0_i32_1 = arith.constant 0 : i32
    return %c0_i32, %c0_i32_0 : i32, i32
  }
  func.func @transform_5(%arg0: i32) -> (i32, i32) {
    %c0_i32 = arith.constant 0 : i32
    %c0_i32_0 = arith.constant 0 : i32
    return %c0_i32, %arg0 : i32, i32
  }
}

</mosaic_0001>

<bundles_post_ra>
// kernel: tpu_custom_call.1
= control target key start
LH: loop header
LB: loop body
LE: loop exit
PB: predicated region body
PF: predicated region fallthrough
CT: control target
= control target key end

     0   :  { %s425_s0 = inlined_call_operand.hbm [shape: f32[8,32], index: 0, kind: input, shape index: {}]   ;;  %s426_s1 = inlined_call_operand.hbm [shape: f32[32,128], index: 1, kind: input, shape index: {}]   ;;  %s427_s2 = inlined_call_operand.vmem [shape: f32[1,128], index: 2, kind: input, shape index: {}]   ;;  %s428_s3 = inlined_call_operand.hbm [shape: f32[8,128], index: 3, kind: input, shape index: {}]   ;;  %s429_s4 = inlined_call_operand.<no memory space> [shape: f32[1,1], index: 4, kind: input, shape index: {}]   ;;  %s430_s5 = inlined_call_operand.hbm [shape: f32[1,8], index: 5, kind: output, shape index: {}]  }
   0x1   :  { %v10_v0 = vstv %s429_s4 }
   0x2   :  { %11 = vst [vmem:[#allocation2] sm:$0x1] %v10_v0 }
   0x3   :  { %12 = vsyncpa [#allocation4], 0 }
   0x4   :  { %13 = vsyncpa [#allocation7], 0 }
   0x5   :  { %14 = vsyncpa [#allocation5], 0  ;;  %s368_s20 = smov [#allocation6]  }
   0x6   :  { %s30_s21 = sshll.u32 %s368_s20, 4  ;;  %s31_s21 = int_to_ptr.vmem [resolvable:$true] %s30_s21 }
   0x7   :  { %s290_s22 = scalar_lea.vmem %s31_s21, 512  ;;  %p295_p1 = scmp.lt.s32.totalorder %s31_s21, %s31_s21 }
   0x8   :  { %p291_p0 = scmp.ne.s32.totalorder %s31_s21, %s290_s22  ;;  %p296_p2 = scmp.lt.s32.totalorder %s290_s22, %s290_s22 }
   0xa   :  { %p297_p3 = por %p296_p2, %p295_p1 }
   0xc   :  { %p298_p4 = pnand %p297_p3, %p291_p0 }
   0xe   :  { %301 = shalt.err (!%p298_p4)
}
   0xf   :  { %s369_s23 = smov 128   ;;  %s370_s24 = smov 8  }
  0x10   :  { %36 = dma.hbm_to_vmem [thread:$0]  %s426_s1, 512, %s31_s21, [#allocation7], %s369_s23, %s369_s23, %s370_s24  }
  0x11   :  { %s371_s4 = smov [#allocation3]   ;;  %s372_s28 = smov [#allocation8]  }
  0x12   :  { %s21_s27 = sshll.u32 %s371_s4, 4  ;;  %s45_s29 = sshll.u32 %s372_s28, 4  ;;  %s22_s27 = int_to_ptr.vmem [resolvable:$true] %s21_s27  ;;  %s46_s29 = int_to_ptr.vmem [resolvable:$true] %s45_s29 }
  0x13   :  { %s310_s30 = scalar_lea.vmem %s22_s27, 128  ;;  %p315_p6 = scmp.lt.s32.totalorder %s22_s27, %s22_s27 }
  0x14   :  { %p311_p5 = scmp.ne.s32.totalorder %s22_s27, %s310_s30  ;;  %p316_p7 = scmp.lt.s32.totalorder %s310_s30, %s310_s30 }
  0x16   :  { %p317_p8 = por %p316_p7, %p315_p6 }
  0x18   :  { %p318_p9 = pnand %p317_p8, %p311_p5 }
  0x1a   :  { %321 = shalt.err (!%p318_p9)
}
  0x1b   :  { %24 = dma.hbm_to_vmem [thread:$0]  %s425_s0, 128, %s22_s27, [#allocation4]  }
  0x1c   :  { %s330_s8 = scalar_lea.vmem %s46_s29, 128  ;;  %p335_p11 = scmp.lt.s32.totalorder %s46_s29, %s46_s29 }
  0x1d   :  { %p331_p10 = scmp.ne.s32.totalorder %s46_s29, %s330_s8  ;;  %p336_p12 = scmp.lt.s32.totalorder %s330_s8, %s330_s8 }
  0x1f   :  { %p337_p13 = por %p336_p12, %p335_p11 }
  0x21   :  { %p338_p0 = pnand %p337_p13, %p331_p10 }
  0x23   :  { %341 = shalt.err (!%p338_p0)
}
  0x24   :  { %48 = dma.hbm_to_vmem [thread:$0]  %s428_s3, 128, %s46_s29, [#allocation7]  }
  0x25   :  { %362 = dma.done.wait [#allocation4], 128  }
  0x26   :  { %363 = vsyncadd [#allocation4], 4294967168 }
  0x27   :  { %364 = dma.done.wait [#allocation7], 640  }
  0x28   :  { %365 = vsyncadd [#allocation7], 4294966656  ;;  %v373_v1 = vmov 0.0   ;;  %vm374_vm0 = vmmov 0   ;;  %v64_v2 = vld [vmem:[#allocation6 + $0x18] sm:$0xff]  ;;  %v63_v3 = vld [vmem:[#allocation6 + $0x10] sm:$0xff]  ;;  %v224_v15 = vlaneseq }
  0x29   :  { %256 = vmatprep.subr.mxu0 %v373_v1  ;;  %264 = vmatprep.mubr.msk.f32.mxu0 %vm374_vm0, %v373_v1  ;;  %v62_v4 = vld [vmem:[#allocation6 + $0x8] sm:$0xff]  ;;  %v61_v5 = vld [vmem:[#allocation6] sm:$0xff]  ;;  %v60_v6 = vld [vmem:[#allocation3] sm:$0xff]  ;;  %vm72_vm1 = vcmask 261120   ;;  %v375_v8 = vmov 0   ;;  %s376_s10 = smov [#allocation9]  }
  0x2a   :  { %267 = vmatprep.subr.mxu1 %v373_v1  ;;  %269 = vmatprep.mubr.msk.f32.mxu1 %vm374_vm0, %v373_v1  ;;  %v218_v7 = vld [vmem:[#allocation2] sm:$0x1]  ;;  %v147_v14 = vld [vmem:[#allocation8] sm:$0xff]  ;;  %v225_v16 = vshrl.u32 %v224_v15, 7  ;;  %s237_s11 = sshll.u32 %s376_s10, 4  ;;  %vm229_vm2 = vcmask 57344   ;;  %s238_s11 = int_to_ptr.vmem [resolvable:$true] %s237_s11 }
  0x2b   :  { %257 = vmatpush3.msra.mxu0 %v64_v2  ;;  %281 = vset.pattern.permute.xlu0 %v375_v8  ;;  %v247_v9 = vld [vmem:[%s427_s2] ss:$0 sm:$0xff]  ;;  %s342_s2 = scalar_lea.vmem %s238_s11, 16  ;;  %s346_s12 = scalar_lea.vmem %s238_s11, 32 }
  0x2c   :  { %258 = vmatprep.subr.mxu0 %v373_v1  ;;  %221 = vperm.xlu0 %281, %v218_v7   ;;  %v226_v17 = vsub.s32 0, %v225_v16  ;;  %p343_p1 = scmp.ne.s32.totalorder %s238_s11, %s342_s2  ;;  %p347_p2 = scmp.lt.s32.totalorder %s238_s11, %s238_s11 }
  0x2d   :  { %259 = vmatpush3.msra.mxu0 %v63_v3  ;;  %p348_p3 = scmp.lt.s32.totalorder %s346_s12, %s342_s2 }
  0x2e   :  { %260 = vmatprep.subr.mxu0 %v373_v1 }
  0x2f   :  { %261 = vmatpush3.msra.mxu0 %v62_v4  ;;  %p349_p4 = por %p348_p3, %p347_p2 }
  0x30   :  { %262 = vmatprep.subr.mxu0 %v373_v1 }
  0x31   :  { %263 = vmatpush3.msra.mxu0 %v61_v5  ;;  %p350_p5 = pnand %p349_p4, %p343_p1 }
  0x32   :  { %265 = vmatmul.mubr.msk.f32.vlgmr.msra.gmra.mxu0 %vm72_vm1, %v60_v6 }
  0xa7   :  { %v222_v18 = vpop.permute.xlu0 %221 }
  0xa8   :  { %v227_v19 = vrot.slane %v222_v18, %v226_v17 }
  0xf2   :  { %v142_v10 = vpop.f32.mrf.mxu0 }
  0xf3   :  { %v143_v11 = vadd.f32 %v247_v9, %v142_v10 }
  0xf4   :  { %v266_v12 = vpop.f32.mrf.mxu0 }
  0xf5   :  { %v146_v13 = vmax.f32 %v143_v11, 0.0 }
  0xf7   :  { %268 = vmatpush3.xpose.msra.mxu1 %v146_v13 }
  0xfa   :  { %270 = vmatmul.mubr.f32.vlgmr.msra.gmra.mxu1 %v147_v14 }
 0x1ba   :  { %v214_v20 = vpop.f32.mrf.mxu1 }
 0x1bb   :  { %v228_v21 = vadd.f32 %v227_v19, %v214_v20 }
 0x1bc   :  { %v271_v22 = vpop.f32.mrf.mxu1 }
 0x1bd   :  { %230 = vst.msk [vmem:[#allocation9] sm:$0x1] %vm229_vm2, %v228_v21 }
 0x1be   :  { %353 = shalt.err (!%p350_p5)
}
 0x1bf   :  { %240 = dma.vmem_to_hbm [thread:$0]  %s238_s11, 16, %s430_s5, [#allocation5]  }
 0x1c0   :  { %366 = dma.done.wait [#allocation5], 16  }
 0x1c1   :  { %367 = vsyncadd [#allocation5], 4294967280 }
 0x1c2   :  { %244 = vsyncpa [#allocation4], 1 }
 0x1c3   :  { %245 = vsyncpa [#allocation7], 1 }
 0x1c4   :  { %246 = vsyncpa [#allocation5], 1 }

</bundles_post_ra>
